<compile_context>
chip_gen: v7x
topology: tpu7x:2x2x1
jax: 0.10.0
libtpu: 0.0.40
codegen_flags: <defaults>
</compile_context>

<pallas_src>
import jax
import jax.numpy as jnp
import numpy as np
from jax.experimental import pallas as pl
from jax.experimental.pallas import tpu as pltpu

_EPS = 1e-12                  # matches torch.nn.functional.normalize default eps
_KL_LANE_WIDTH = 512          # lane-dense packing width for KL (multiple of 128)
_TARGET_TILE_BYTES = 2 << 20  # ~2 MiB per input tile (2 inputs x 2 bufs ~ 8 MiB)


def _round_up(x, m):
    return -(-x // m) * m


# ---------------------------------------------------------------------------
# Kernel 1: cosine-similarity row sum.
#   x, y : (tm, D) tiles. Accumulates sum over rows of (x_hat . y_hat).
#   Zero-padded rows contribute exactly 0 (norm clamped to eps, sxy = 0).
# ---------------------------------------------------------------------------
def _cos_sum_kernel(x_ref, y_ref, out_ref, acc_ref):
    @pl.when(pl.program_id(1) == 0)
    def _():
        acc_ref[...] = jnp.zeros_like(acc_ref)

    x = x_ref[...].astype(jnp.float32)
    y = y_ref[...].astype(jnp.float32)
    # Three per-row sums instead of materializing x/||x|| and y/||y|| tiles.
    sxy = jnp.sum(x * y, axis=-1, keepdims=True)   # (tm, 1)
    sxx = jnp.sum(x * x, axis=-1, keepdims=True)
    syy = jnp.sum(y * y, axis=-1, keepdims=True)
    nx = jnp.maximum(jnp.sqrt(sxx), _EPS)
    ny = jnp.maximum(jnp.sqrt(syy), _EPS)
    acc_ref[...] += sxy / (nx * ny)                # (tm, 1) vector partials

    @pl.when(pl.program_id(1) == pl.num_programs(1) - 1)
    def _():
        out_ref[...] = jnp.full((1, 1), jnp.sum(acc_ref[...]), dtype=jnp.float32)


# ---------------------------------------------------------------------------
# Kernel 2: KL-divergence total sum:  sum( t * (log t - log s) ), 0*log0 := 0.
#   s, t : (tm, W) lane-packed tiles, s > 0 (padded with s=1, t=0 -> term 0).
#   Single log per element: t * log(t / s).
# ---------------------------------------------------------------------------
def _kl_sum_kernel(s_ref, t_ref, out_ref, acc_ref):
    @pl.when(pl.program_id(1) == 0)
    def _():
        acc_ref[...] = jnp.zeros_like(acc_ref)

    s = s_ref[...].astype(jnp.float32)
    t = t_ref[...].astype(jnp.float32)
    ratio = jnp.where(t > 0, t / s, 1.0)           # t == 0 -> log(1) = 0 -> term 0
    acc_ref[...] += t * jnp.log(ratio)             # (tm, W) partials, no per-step reduce

    @pl.when(pl.program_id(1) == pl.num_programs(1) - 1)
    def _():
        out_ref[...] = jnp.full((1, 1), jnp.sum(acc_ref[...]), dtype=jnp.float32)


# ---------------------------------------------------------------------------
# Shared driver: tiled scalar reduction over row blocks of two (R, W) arrays.
# ---------------------------------------------------------------------------
def _sum_reduce_call(kernel, x, y, *, acc_cols=None, x_pad=0.0, y_pad=0.0):
    R, W = x.shape
    itemsize = max(jnp.dtype(x.dtype).itemsize, jnp.dtype(y.dtype).itemsize)

    # Tile rows sized by bytes (~2 MiB per input tile), multiple of 8 sublanes.
    tm = max(8, (_TARGET_TILE_BYTES // (W * itemsize)) // 8 * 8)
    rows8 = _round_up(max(R, 1), 8)
    tm = min(tm, rows8)
    nblk = -(-rows8 // tm)
    nsplit = 2 if nblk >= 2 else 1                 # feed both TensorCores on v7x
    nblk = _round_up(nblk, nsplit)
    rows_p = nblk * tm
    if rows_p != R:
        x = jnp.pad(x, ((0, rows_p - R), (0, 0)), constant_values=x_pad)
        y = jnp.pad(y, ((0, rows_p - R), (0, 0)), constant_values=y_pad)

    n_inner = nblk // nsplit
    acc_c = W if acc_cols is None else acc_cols
    in_map = lambda p, i: (p * n_inner + i, 0)

    partials = pl.pallas_call(
        kernel,
        out_shape=jax.ShapeDtypeStruct((nsplit, 1), jnp.float32),
        grid_spec=pltpu.PrefetchScalarGridSpec(
            num_scalar_prefetch=0,
            grid=(nsplit, n_inner),
            in_specs=[
                pl.BlockSpec((tm, W), in_map),
                pl.BlockSpec((tm, W), in_map),
            ],
            out_specs=pl.BlockSpec((1, 1), lambda p, i: (p, 0)),
            scratch_shapes=[pltpu.VMEM((tm, acc_c), jnp.float32)],
        ),
        compiler_params=pltpu.CompilerParams(
            dimension_semantics=("parallel", "arbitrary")),
    )(x, y)
    return jnp.sum(partials)


def _cosine_row_sum(x, y):
    """sum over rows of cos(normalize(x_row), normalize(y_row)); x, y: (M, D)."""
    return _sum_reduce_call(_cos_sum_kernel, x, y, acc_cols=1, x_pad=0.0, y_pad=0.0)


def _kl_total_sum(s, t):
    """sum over all elements of KLDivLoss(reduction='none')(log s, t); same shapes."""
    s_flat = s.reshape(-1)
    t_flat = t.reshape(-1)
    n = s_flat.shape[0]
    w = _KL_LANE_WIDTH
    pad = _round_up(n, w) - n
    if pad:
        s_flat = jnp.pad(s_flat, (0, pad), constant_values=1.0)  # log(1) = 0
        t_flat = jnp.pad(t_flat, (0, pad), constant_values=0.0)  # t = 0 -> term 0
    s2 = s_flat.reshape(-1, w)   # lane-dense repack (contiguous, metadata-only)
    t2 = t_flat.reshape(-1, w)
    return _sum_reduce_call(_kl_sum_kernel, s2, t2, acc_cols=None, x_pad=1.0, y_pad=0.0)


# ---------------------------------------------------------------------------
# CSMKDLoss forward: pair bookkeeping in Python, hot path in 3 fused kernels.
# ---------------------------------------------------------------------------
def csmkd_loss(s_feats, s_feats_patch, s_atten, t_feats, t_feats_patch, t_atten,
               nimages, ncrops):
    s_feats_c = jnp.split(s_feats, ncrops, axis=0)
    s_fp_c = jnp.split(s_feats_patch, nimages, axis=0)
    t_feats_c = jnp.split(t_feats, nimages, axis=0)        # teacher: detached (fwd only)
    t_fp_c = jnp.split(t_feats_patch, nimages, axis=0)

    s_qk_c = jnp.split(s_atten[0], nimages, axis=0)
    s_vv_c = jnp.split(s_atten[1], nimages, axis=0)
    t_qk_c = jnp.split(t_atten[0], nimages, axis=0)
    t_vv_c = jnp.split(t_atten[1], nimages, axis=0)

    feat_s, feat_t = [], []      # (B, D) cosine pairs
    patch_s, patch_t = [], []    # (B, P, D) cosine pairs
    kl_s, kl_t = [], []          # (B, H, T, T) KL pairs (qk and vv)
    n_rep = 0
    n_att = 0
    for iq in range(nimages):
        for v in range(ncrops):
            if v < 2 and v == iq:
                # TODO(synk): F.interpolate path for mismatched attention map sizes
                # is not implemented; student/teacher attention shapes assumed equal.
                kl_s += [s_qk_c[v], s_vv_c[v]]
                kl_t += [t_qk_c[iq], t_vv_c[iq]]
                n_att += 1
                patch_s.append(s_fp_c[v])
                patch_t.append(t_fp_c[iq])
                n_rep += 1
            else:
                feat_s.append(s_feats_c[v])
                feat_t.append(t_feats_c[iq])
                n_rep += 1

    rep_sum = jnp.zeros((), jnp.float32)
    if feat_s:
        D = feat_s[0].shape[-1]
        rows_per_pair = int(np.prod(feat_s[0].shape[:-1]))
        xs = jnp.concatenate([a.reshape(-1, D) for a in feat_s], axis=0)
        ys = jnp.concatenate([a.reshape(-1, D) for a in feat_t], axis=0)
        rep_sum = rep_sum - _cosine_row_sum(xs, ys) / rows_per_pair
    if patch_s:
        D = patch_s[0].shape[-1]
        rows_per_pair = int(np.prod(patch_s[0].shape[:-1]))
        xs = jnp.concatenate([a.reshape(-1, D) for a in patch_s], axis=0)
        ys = jnp.concatenate([a.reshape(-1, D) for a in patch_t], axis=0)
        rep_sum = rep_sum - _cosine_row_sum(xs, ys) / rows_per_pair
    rep_loss = rep_sum / n_rep

    if kl_s:
        rows_per_term = int(np.prod(kl_s[0].shape[:-1]))   # B*H*T attention rows
        ss = jnp.concatenate([a.reshape(-1) for a in kl_s], axis=0)
        tt = jnp.concatenate([a.reshape(-1) for a in kl_t], axis=0)
        att_loss = _kl_total_sum(ss, tt) / (rows_per_term * n_att)
    else:
        att_loss = jnp.zeros((), jnp.float32)

    return {"align_rep_loss": rep_loss, "align_att_loss": att_loss}


# ---------------------------------------------------------------------------
# Pure-JAX reference for correctness check.
# ---------------------------------------------------------------------------
def _ref_neg_cos_mean(x, y):
    D = x.shape[-1]
    x = x.reshape(-1, D).astype(jnp.float32)
    y = y.reshape(-1, D).astype(jnp.float32)
    nx = jnp.maximum(jnp.linalg.norm(x, axis=-1, keepdims=True), _EPS)
    ny = jnp.maximum(jnp.linalg.norm(y, axis=-1, keepdims=True), _EPS)
    return jnp.mean(-jnp.sum((x / nx) * (y / ny), axis=-1))


def _ref_kl(s, t):
    s = s.astype(jnp.float32)
    t = t.astype(jnp.float32)
    term = jnp.where(t > 0, t * (jnp.log(jnp.where(t > 0, t, 1.0)) - jnp.log(s)), 0.0)
    return jnp.mean(jnp.sum(term, axis=-1))


def _ref_csmkd(s_feats, s_feats_patch, s_atten, t_feats, t_feats_patch, t_atten,
               nimages, ncrops):
    s_feats_c = jnp.split(s_feats, ncrops, 0)
    s_fp_c = jnp.split(s_feats_patch, nimages, 0)
    t_feats_c = jnp.split(t_feats, nimages, 0)
    t_fp_c = jnp.split(t_feats_patch, nimages, 0)
    s_qk_c = jnp.split(s_atten[0], nimages, 0)
    s_vv_c = jnp.split(s_atten[1], nimages, 0)
    t_qk_c = jnp.split(t_atten[0], nimages, 0)
    t_vv_c = jnp.split(t_atten[1], nimages, 0)
    rep, att, nrep, natt = 0.0, 0.0, 0, 0
    for iq in range(nimages):
        for v in range(ncrops):
            if v < 2 and v == iq:
                att = att + _ref_kl(s_qk_c[v], t_qk_c[iq]) + _ref_kl(s_vv_c[v], t_vv_c[iq])
                natt += 1
                rep = rep + _ref_neg_cos_mean(s_fp_c[v], t_fp_c[iq])
                nrep += 1
            else:
                rep = rep + _ref_neg_cos_mean(s_feats_c[v], t_feats_c[iq])
                nrep += 1
    return {"align_rep_loss": rep / nrep, "align_att_loss": att / natt}


if __name__ == "__main__":
    nimages, ncrops = 2, 4
    B, D, P, H, T = 2, 32, 16, 4, 16

    key = jax.random.PRNGKey(0)
    ks = jax.random.split(key, 8)
    s_feats = jax.random.normal(ks[0], (ncrops * B, D), jnp.float32)
    t_feats = jax.random.normal(ks[1], (nimages * B, D), jnp.float32)
    s_feats_patch = jax.random.normal(ks[2], (nimages * B, P, D), jnp.float32)
    t_feats_patch = jax.random.normal(ks[3], (nimages * B, P, D), jnp.float32)
    # attention maps: softmax over key dim (strictly positive probabilities)
    s_qk = jax.nn.softmax(jax.random.normal(ks[4], (nimages * B, H, T, T)), axis=-1)
    s_vv = jax.nn.softmax(jax.random.normal(ks[5], (nimages * B, H, T, T)), axis=-1)
    t_qk = jax.nn.softmax(jax.random.normal(ks[6], (nimages * B, H, T, T)), axis=-1)
    t_vv = jax.nn.softmax(jax.random.normal(ks[7], (nimages * B, H, T, T)), axis=-1)

    loss_fn = jax.jit(csmkd_loss, static_argnames=("nimages", "ncrops"))
    out = loss_fn(s_feats, s_feats_patch, (s_qk, s_vv),
                  t_feats, t_feats_patch, (t_qk, t_vv),
                  nimages=nimages, ncrops=ncrops)
    out = jax.tree_util.tree_map(jax.block_until_ready, out)

    ref = _ref_csmkd(s_feats, s_feats_patch, (s_qk, s_vv),
                     t_feats, t_feats_patch, (t_qk, t_vv), nimages, ncrops)
    np.testing.assert_allclose(np.asarray(out["align_rep_loss"]),
                               np.asarray(ref["align_rep_loss"]), rtol=1e-4, atol=1e-5)
    np.testing.assert_allclose(np.asarray(out["align_att_loss"]),
                               np.asarray(ref["align_att_loss"]), rtol=1e-4, atol=1e-5)

    print("KERNEL_OK")
</pallas_src>

<mosaic_0001>
module attributes {stable_mosaic.version = 11 : i64} {
  func.func @_cos_sum_kernel(%arg0: i32, %arg1: i32, %arg2: memref<16x32xf32, #tpu.memory_space<vmem>>, %arg3: memref<16x32xf32, #tpu.memory_space<vmem>>, %arg4: memref<1x1xf32, #tpu.memory_space<vmem>>, %arg5: memref<16x1xf32, #tpu.memory_space<vmem>>) attributes {dimension_semantics = [#tpu.dimension_semantics<parallel>, #tpu.dimension_semantics<arbitrary>], iteration_bounds = array<i64: 1, 1>, scalar_prefetch = 0 : i64, scratch_operands = 1 : i64, tpu.core_type = #tpu.core_type<tc>, window_params = [{transform_indices = @transform_0, window_bounds = array<i64: 16, 32>}, {transform_indices = @transform_1, window_bounds = array<i64: 16, 32>}, {transform_indices = @transform_2, window_bounds = array<i64: 1, 1>}]} {
    %c0_i32 = arith.constant 0 : i32
    %0 = arith.cmpi eq, %arg1, %c0_i32 : i32
    %1 = arith.extui %0 : i1 to i32
    %c0_i32_0 = arith.constant 0 : i32
    %2 = arith.cmpi ne, %1, %c0_i32_0 : i32
    scf.if %2 {
      %cst_14 = arith.constant 0.000000e+00 : f32
      %28 = vector.broadcast %cst_14 : f32 to vector<16x1xf32>
      %c0_15 = arith.constant 0 : index
      %c0_16 = arith.constant 0 : index
      %29 = vector.load %arg5[%c0_15, %c0_16] : memref<16x1xf32, #tpu.memory_space<vmem>>, vector<16x1xf32>
      tpu.vector_store %arg5[%c0_15, %c0_16], %28 {strides = array<i32>} : memref<16x1xf32, #tpu.memory_space<vmem>>, vector<16x1xf32>,
    } else {
    }
    %c0 = arith.constant 0 : index
    %c0_1 = arith.constant 0 : index
    %3 = vector.load %arg2[%c0, %c0_1] : memref<16x32xf32, #tpu.memory_space<vmem>>, vector<16x32xf32>
    %c0_2 = arith.constant 0 : index
    %c0_3 = arith.constant 0 : index
    %4 = vector.load %arg3[%c0_2, %c0_3] : memref<16x32xf32, #tpu.memory_space<vmem>>, vector<16x32xf32>
    %5 = arith.mulf %3, %4 : vector<16x32xf32>
    %cst = arith.constant dense<0.000000e+00> : vector<16xf32>
    %6 = vector.multi_reduction <add>, %5, %cst [1] : vector<16x32xf32> to vector<16xf32>
    %7 = vector.shape_cast %6 : vector<16xf32> to vector<16x1xf32>
    %8 = arith.mulf %3, %3 : vector<16x32xf32>
    %cst_4 = arith.constant dense<0.000000e+00> : vector<16xf32>
    %9 = vector.multi_reduction <add>, %8, %cst_4 [1] : vector<16x32xf32> to vector<16xf32>
    %10 = vector.shape_cast %9 : vector<16xf32> to vector<16x1xf32>
    %11 = arith.mulf %4, %4 : vector<16x32xf32>
    %cst_5 = arith.constant dense<0.000000e+00> : vector<16xf32>
    %12 = vector.multi_reduction <add>, %11, %cst_5 [1] : vector<16x32xf32> to vector<16xf32>
    %13 = vector.shape_cast %12 : vector<16xf32> to vector<16x1xf32>
    %14 = math.sqrt %10 : vector<16x1xf32>
    %cst_6 = arith.constant 9.99999996E-13 : f32
    %15 = vector.broadcast %cst_6 : f32 to vector<16x1xf32>
    %16 = arith.maximumf %14, %15 : vector<16x1xf32>
    %17 = math.sqrt %13 : vector<16x1xf32>
    %cst_7 = arith.constant 9.99999996E-13 : f32
    %18 = vector.broadcast %cst_7 : f32 to vector<16x1xf32>
    %19 = arith.maximumf %17, %18 : vector<16x1xf32>
    %c0_8 = arith.constant 0 : index
    %c0_9 = arith.constant 0 : index
    %20 = vector.load %arg5[%c0_8, %c0_9] : memref<16x1xf32, #tpu.memory_space<vmem>>, vector<16x1xf32>
    %21 = arith.mulf %16, %19 : vector<16x1xf32>
    %22 = arith.divf %7, %21 : vector<16x1xf32>
    %23 = arith.addf %20, %22 : vector<16x1xf32>
    %c0_10 = arith.constant 0 : index
    %c0_11 = arith.constant 0 : index
    %24 = vector.load %arg5[%c0_10, %c0_11] : memref<16x1xf32, #tpu.memory_space<vmem>>, vector<16x1xf32>
    tpu.vector_store %arg5[%c0_10, %c0_11], %23 {strides = array<i32>} : memref<16x1xf32, #tpu.memory_space<vmem>>, vector<16x1xf32>,
    %c0_i32_12 = arith.constant 0 : i32
    %25 = arith.cmpi eq, %arg1, %c0_i32_12 : i32
    %26 = arith.extui %25 : i1 to i32
    %c0_i32_13 = arith.constant 0 : i32
    %27 = arith.cmpi ne, %26, %c0_i32_13 : i32
    scf.if %27 {
      %c0_14 = arith.constant 0 : index
      %c0_15 = arith.constant 0 : index
      %28 = vector.load %arg5[%c0_14, %c0_15] : memref<16x1xf32, #tpu.memory_space<vmem>>, vector<16x1xf32>
      %29 = vector.shape_cast %28 : vector<16x1xf32> to vector<1x16x1xf32>
      %cst_16 = arith.constant dense<0.000000e+00> : vector<1xf32>
      %30 = vector.multi_reduction <add>, %29, %cst_16 [1, 2] : vector<1x16x1xf32> to vector<1xf32>
      %31 = vector.shape_cast %30 : vector<1xf32> to vector<1x1x1xf32>
      %32 = vector.extract %31[0, 0, 0] : f32 from vector<1x1x1xf32>
      %33 = vector.broadcast %32 : f32 to vector<1x1xf32>
      %c0_17 = arith.constant 0 : index
      %c0_18 = arith.constant 0 : index
      %34 = vector.load %arg4[%c0_17, %c0_18] : memref<1x1xf32, #tpu.memory_space<vmem>>, vector<1x1xf32>
      tpu.vector_store %arg4[%c0_17, %c0_18], %33 {strides = array<i32>} : memref<1x1xf32, #tpu.memory_space<vmem>>, vector<1x1xf32>,
    } else {
    }
    return
  }
  func.func @transform_0(%arg0: i32, %arg1: i32) -> (i32, i32) {
    %c1_i32 = arith.constant 1 : i32
    %0 = arith.muli %arg0, %c1_i32 : i32
    %1 = arith.addi %0, %arg1 : i32
    %c0_i32 = arith.constant 0 : i32
    %c0_i32_0 = arith.constant 0 : i32
    return %1, %c0_i32 : i32, i32
  }
  func.func @transform_1(%arg0: i32, %arg1: i32) -> (i32, i32) {
    %c1_i32 = arith.constant 1 : i32
    %0 = arith.muli %arg0, %c1_i32 : i32
    %1 = arith.addi %0, %arg1 : i32
    %c0_i32 = arith.constant 0 : i32
    %c0_i32_0 = arith.constant 0 : i32
    return %1, %c0_i32 : i32, i32
  }
  func.func @transform_2(%arg0: i32, %arg1: i32) -> (i32, i32) {
    %c0_i32 = arith.constant 0 : i32
    %c0_i32_0 = arith.constant 0 : i32
    return %arg0, %c0_i32 : i32, i32
  }
}

module attributes {stable_mosaic.version = 11 : i64} {
  func.func @_cos_sum_kernel(%arg0: i32, %arg1: i32, %arg2: memref<64x32xf32, #tpu.memory_space<vmem>>, %arg3: memref<64x32xf32, #tpu.memory_space<vmem>>, %arg4: memref<1x1xf32, #tpu.memory_space<vmem>>, %arg5: memref<64x1xf32, #tpu.memory_space<vmem>>) attributes {dimension_semantics = [#tpu.dimension_semantics<parallel>, #tpu.dimension_semantics<arbitrary>], iteration_bounds = array<i64: 1, 1>, scalar_prefetch = 0 : i64, scratch_operands = 1 : i64, tpu.core_type = #tpu.core_type<tc>, window_params = [{transform_indices = @transform_0, window_bounds = array<i64: 64, 32>}, {transform_indices = @transform_1, window_bounds = array<i64: 64, 32>}, {transform_indices = @transform_2, window_bounds = array<i64: 1, 1>}]} {
    %c0_i32 = arith.constant 0 : i32
    %0 = arith.cmpi eq, %arg1, %c0_i32 : i32
    %1 = arith.extui %0 : i1 to i32
    %c0_i32_0 = arith.constant 0 : i32
    %2 = arith.cmpi ne, %1, %c0_i32_0 : i32
    scf.if %2 {
      %cst_14 = arith.constant 0.000000e+00 : f32
      %28 = vector.broadcast %cst_14 : f32 to vector<64x1xf32>
      %c0_15 = arith.constant 0 : index
      %c0_16 = arith.constant 0 : index
      %29 = vector.load %arg5[%c0_15, %c0_16] : memref<64x1xf32, #tpu.memory_space<vmem>>, vector<64x1xf32>
      tpu.vector_store %arg5[%c0_15, %c0_16], %28 {strides = array<i32>} : memref<64x1xf32, #tpu.memory_space<vmem>>, vector<64x1xf32>,
    } else {
    }
    %c0 = arith.constant 0 : index
    %c0_1 = arith.constant 0 : index
    %3 = vector.load %arg2[%c0, %c0_1] : memref<64x32xf32, #tpu.memory_space<vmem>>, vector<64x32xf32>
    %c0_2 = arith.constant 0 : index
    %c0_3 = arith.constant 0 : index
    %4 = vector.load %arg3[%c0_2, %c0_3] : memref<64x32xf32, #tpu.memory_space<vmem>>, vector<64x32xf32>
    %5 = arith.mulf %3, %4 : vector<64x32xf32>
    %cst = arith.constant dense<0.000000e+00> : vector<64xf32>
    %6 = vector.multi_reduction <add>, %5, %cst [1] : vector<64x32xf32> to vector<64xf32>
    %7 = vector.shape_cast %6 : vector<64xf32> to vector<64x1xf32>
    %8 = arith.mulf %3, %3 : vector<64x32xf32>
    %cst_4 = arith.constant dense<0.000000e+00> : vector<64xf32>
    %9 = vector.multi_reduction <add>, %8, %cst_4 [1] : vector<64x32xf32> to vector<64xf32>
    %10 = vector.shape_cast %9 : vector<64xf32> to vector<64x1xf32>
    %11 = arith.mulf %4, %4 : vector<64x32xf32>
    %cst_5 = arith.constant dense<0.000000e+00> : vector<64xf32>
    %12 = vector.multi_reduction <add>, %11, %cst_5 [1] : vector<64x32xf32> to vector<64xf32>
    %13 = vector.shape_cast %12 : vector<64xf32> to vector<64x1xf32>
    %14 = math.sqrt %10 : vector<64x1xf32>
    %cst_6 = arith.constant 9.99999996E-13 : f32
    %15 = vector.broadcast %cst_6 : f32 to vector<64x1xf32>
    %16 = arith.maximumf %14, %15 : vector<64x1xf32>
    %17 = math.sqrt %13 : vector<64x1xf32>
    %cst_7 = arith.constant 9.99999996E-13 : f32
    %18 = vector.broadcast %cst_7 : f32 to vector<64x1xf32>
    %19 = arith.maximumf %17, %18 : vector<64x1xf32>
    %c0_8 = arith.constant 0 : index
    %c0_9 = arith.constant 0 : index
    %20 = vector.load %arg5[%c0_8, %c0_9] : memref<64x1xf32, #tpu.memory_space<vmem>>, vector<64x1xf32>
    %21 = arith.mulf %16, %19 : vector<64x1xf32>
    %22 = arith.divf %7, %21 : vector<64x1xf32>
    %23 = arith.addf %20, %22 : vector<64x1xf32>
    %c0_10 = arith.constant 0 : index
    %c0_11 = arith.constant 0 : index
    %24 = vector.load %arg5[%c0_10, %c0_11] : memref<64x1xf32, #tpu.memory_space<vmem>>, vector<64x1xf32>
    tpu.vector_store %arg5[%c0_10, %c0_11], %23 {strides = array<i32>} : memref<64x1xf32, #tpu.memory_space<vmem>>, vector<64x1xf32>,
    %c0_i32_12 = arith.constant 0 : i32
    %25 = arith.cmpi eq, %arg1, %c0_i32_12 : i32
    %26 = arith.extui %25 : i1 to i32
    %c0_i32_13 = arith.constant 0 : i32
    %27 = arith.cmpi ne, %26, %c0_i32_13 : i32
    scf.if %27 {
      %c0_14 = arith.constant 0 : index
      %c0_15 = arith.constant 0 : index
      %28 = vector.load %arg5[%c0_14, %c0_15] : memref<64x1xf32, #tpu.memory_space<vmem>>, vector<64x1xf32>
      %29 = vector.shape_cast %28 : vector<64x1xf32> to vector<1x64x1xf32>
      %cst_16 = arith.constant dense<0.000000e+00> : vector<1xf32>
      %30 = vector.multi_reduction <add>, %29, %cst_16 [1, 2] : vector<1x64x1xf32> to vector<1xf32>
      %31 = vector.shape_cast %30 : vector<1xf32> to vector<1x1x1xf32>
      %32 = vector.extract %31[0, 0, 0] : f32 from vector<1x1x1xf32>
      %33 = vector.broadcast %32 : f32 to vector<1x1xf32>
      %c0_17 = arith.constant 0 : index
      %c0_18 = arith.constant 0 : index
      %34 = vector.load %arg4[%c0_17, %c0_18] : memref<1x1xf32, #tpu.memory_space<vmem>>, vector<1x1xf32>
      tpu.vector_store %arg4[%c0_17, %c0_18], %33 {strides = array<i32>} : memref<1x1xf32, #tpu.memory_space<vmem>>, vector<1x1xf32>,
    } else {
    }
    return
  }
  func.func @transform_0(%arg0: i32, %arg1: i32) -> (i32, i32) {
    %c1_i32 = arith.constant 1 : i32
    %0 = arith.muli %arg0, %c1_i32 : i32
    %1 = arith.addi %0, %arg1 : i32
    %c0_i32 = arith.constant 0 : i32
    %c0_i32_0 = arith.constant 0 : i32
    return %1, %c0_i32 : i32, i32
  }
  func.func @transform_1(%arg0: i32, %arg1: i32) -> (i32, i32) {
    %c1_i32 = arith.constant 1 : i32
    %0 = arith.muli %arg0, %c1_i32 : i32
    %1 = arith.addi %0, %arg1 : i32
    %c0_i32 = arith.constant 0 : i32
    %c0_i32_0 = arith.constant 0 : i32
    return %1, %c0_i32 : i32, i32
  }
  func.func @transform_2(%arg0: i32, %arg1: i32) -> (i32, i32) {
    %c0_i32 = arith.constant 0 : i32
    %c0_i32_0 = arith.constant 0 : i32
    return %arg0, %c0_i32 : i32, i32
  }
}

module attributes {stable_mosaic.version = 11 : i64} {
  func.func @_kl_sum_kernel(%arg0: i32, %arg1: i32, %arg2: memref<16x512xf32, #tpu.memory_space<vmem>>, %arg3: memref<16x512xf32, #tpu.memory_space<vmem>>, %arg4: memref<1x1xf32, #tpu.memory_space<vmem>>, %arg5: memref<16x512xf32, #tpu.memory_space<vmem>>) attributes {dimension_semantics = [#tpu.dimension_semantics<parallel>, #tpu.dimension_semantics<arbitrary>], iteration_bounds = array<i64: 1, 1>, scalar_prefetch = 0 : i64, scratch_operands = 1 : i64, tpu.core_type = #tpu.core_type<tc>, window_params = [{transform_indices = @transform_0, window_bounds = array<i64: 16, 512>}, {transform_indices = @transform_1, window_bounds = array<i64: 16, 512>}, {transform_indices = @transform_2, window_bounds = array<i64: 1, 1>}]} {
    %c0_i32 = arith.constant 0 : i32
    %0 = arith.cmpi eq, %arg1, %c0_i32 : i32
    %1 = arith.extui %0 : i1 to i32
    %c0_i32_0 = arith.constant 0 : i32
    %2 = arith.cmpi ne, %1, %c0_i32_0 : i32
    scf.if %2 {
      %cst_11 = arith.constant 0.000000e+00 : f32
      %18 = vector.broadcast %cst_11 : f32 to vector<16x512xf32>
      %c0_12 = arith.constant 0 : index
      %c0_13 = arith.constant 0 : index
      %19 = vector.load %arg5[%c0_12, %c0_13] : memref<16x512xf32, #tpu.memory_space<vmem>>, vector<16x512xf32>
      tpu.vector_store %arg5[%c0_12, %c0_13], %18 {strides = array<i32>} : memref<16x512xf32, #tpu.memory_space<vmem>>, vector<16x512xf32>,
    } else {
    }
    %c0 = arith.constant 0 : index
    %c0_1 = arith.constant 0 : index
    %3 = vector.load %arg2[%c0, %c0_1] : memref<16x512xf32, #tpu.memory_space<vmem>>, vector<16x512xf32>
    %c0_2 = arith.constant 0 : index
    %c0_3 = arith.constant 0 : index
    %4 = vector.load %arg3[%c0_2, %c0_3] : memref<16x512xf32, #tpu.memory_space<vmem>>, vector<16x512xf32>
    %cst = arith.constant 0.000000e+00 : f32
    %5 = vector.broadcast %cst : f32 to vector<16x512xf32>
    %6 = arith.cmpf ogt, %4, %5 : vector<16x512xf32>
    %7 = arith.divf %4, %3 : vector<16x512xf32>
    %cst_4 = arith.constant 1.000000e+00 : f32
    %8 = vector.broadcast %cst_4 : f32 to vector<16x512xf32>
    %9 = arith.select %6, %7, %8 : vector<16x512xi1>, vector<16x512xf32>
    %c0_5 = arith.constant 0 : index
    %c0_6 = arith.constant 0 : index
    %10 = vector.load %arg5[%c0_5, %c0_6] : memref<16x512xf32, #tpu.memory_space<vmem>>, vector<16x512xf32>
    %11 = math.log %9 : vector<16x512xf32>
    %12 = arith.mulf %4, %11 : vector<16x512xf32>
    %13 = arith.addf %10, %12 : vector<16x512xf32>
    %c0_7 = arith.constant 0 : index
    %c0_8 = arith.constant 0 : index
    %14 = vector.load %arg5[%c0_7, %c0_8] : memref<16x512xf32, #tpu.memory_space<vmem>>, vector<16x512xf32>
    tpu.vector_store %arg5[%c0_7, %c0_8], %13 {strides = array<i32>} : memref<16x512xf32, #tpu.memory_space<vmem>>, vector<16x512xf32>,
    %c0_i32_9 = arith.constant 0 : i32
    %15 = arith.cmpi eq, %arg1, %c0_i32_9 : i32
    %16 = arith.extui %15 : i1 to i32
    %c0_i32_10 = arith.constant 0 : i32
    %17 = arith.cmpi ne, %16, %c0_i32_10 : i32
    scf.if %17 {
      %c0_11 = arith.constant 0 : index
      %c0_12 = arith.constant 0 : index
      %18 = vector.load %arg5[%c0_11, %c0_12] : memref<16x512xf32, #tpu.memory_space<vmem>>, vector<16x512xf32>
      %19 = vector.shape_cast %18 : vector<16x512xf32> to vector<1x16x512xf32>
      %cst_13 = arith.constant dense<0.000000e+00> : vector<1xf32>
      %20 = vector.multi_reduction <add>, %19, %cst_13 [1, 2] : vector<1x16x512xf32> to vector<1xf32>
      %21 = vector.shape_cast %20 : vector<1xf32> to vector<1x1x1xf32>
      %22 = vector.extract %21[0, 0, 0] : f32 from vector<1x1x1xf32>
      %23 = vector.broadcast %22 : f32 to vector<1x1xf32>
      %c0_14 = arith.constant 0 : index
      %c0_15 = arith.constant 0 : index
      %24 = vector.load %arg4[%c0_14, %c0_15] : memref<1x1xf32, #tpu.memory_space<vmem>>, vector<1x1xf32>
      tpu.vector_store %arg4[%c0_14, %c0_15], %23 {strides = array<i32>} : memref<1x1xf32, #tpu.memory_space<vmem>>, vector<1x1xf32>,
    } else {
    }
    return
  }
  func.func @transform_0(%arg0: i32, %arg1: i32) -> (i32, i32) {
    %c1_i32 = arith.constant 1 : i32
    %0 = arith.muli %arg0, %c1_i32 : i32
    %1 = arith.addi %0, %arg1 : i32
    %c0_i32 = arith.constant 0 : i32
    %c0_i32_0 = arith.constant 0 : i32
    return %1, %c0_i32 : i32, i32
  }
  func.func @transform_1(%arg0: i32, %arg1: i32) -> (i32, i32) {
    %c1_i32 = arith.constant 1 : i32
    %0 = arith.muli %arg0, %c1_i32 : i32
    %1 = arith.addi %0, %arg1 : i32
    %c0_i32 = arith.constant 0 : i32
    %c0_i32_0 = arith.constant 0 : i32
    return %1, %c0_i32 : i32, i32
  }
  func.func @transform_2(%arg0: i32, %arg1: i32) -> (i32, i32) {
    %c0_i32 = arith.constant 0 : i32
    %c0_i32_0 = arith.constant 0 : i32
    return %arg0, %c0_i32 : i32, i32
  }
}

</mosaic_0001>

<bundles_post_ra>
// kernel: csmkd_loss.4
= control target key start
LH: loop header
LB: loop body
LE: loop exit
PB: predicated region body
PF: predicated region fallthrough
CT: control target
= control target key end

     0   :  { %vm93_vm0 = vcmask 261120   ;;  %s775_s0 = inlined_call_operand.vmem [shape: f32[64,32], index: 0, kind: input, shape index: {}]   ;;  %s776_s1 = inlined_call_operand.vmem [shape: f32[64,32], index: 1, kind: input, shape index: {}]   ;;  %s777_s2 = inlined_call_operand.hbm [shape: f32[1,1], index: 2, kind: output, shape index: {}]  }
   0x1   :  { %v519_v0 = vld [vmem:[%s776_s1] sm:$0xff]  ;;  %v78_v2 = vld [vmem:[%s776_s1 + $0x8] sm:$0xff]  ;;  %v79_v8 = vld [vmem:[%s776_s1 + $0x10] sm:$0xff] }
   0x2   :  { %v69_v1 = vld [vmem:[%s775_s0] sm:$0xff]  ;;  %v150_v3 = vmul.f32 %v519_v0, %v519_v0  ;;  %v151_v5 = vmul.f32 %v78_v2, %v78_v2  ;;  %v70_v6 = vld [vmem:[%s775_s0 + $0x8] sm:$0xff]  ;;  %v71_v9 = vld [vmem:[%s775_s0 + $0x10] sm:$0xff]  ;;  %v152_v14 = vmul.f32 %v79_v8, %v79_v8 }
   0x3   :  { %v118_v4 = vmul.f32 %v69_v1, %v69_v1  ;;  %v119_v7 = vmul.f32 %v70_v6, %v70_v6  ;;  %v120_v15 = vmul.f32 %v71_v9, %v71_v9 }
   0x4   :  { %v158_v10 = vsel %vm93_vm0, %v150_v3, 0.0  ;;  %v161_v12 = vsel %vm93_vm0, %v151_v5, 0.0 }
   0x5   :  { %v126_v11 = vsel %vm93_vm0, %v118_v4, 0.0  ;;  %159 = vadd.xlane.f32.xlu1 %v158_v10  ;;  %v129_v13 = vsel %vm93_vm0, %v119_v7, 0.0 }
   0x6   :  { %127 = vadd.xlane.f32.xlu0 %v126_v11 }
   0x7   :  { %7 = vsyncpa [#allocation4], 0  ;;  %v80_v16 = vld [vmem:[%s776_s1 + $0x18] sm:$0xff]  ;;  %v164_v18 = vsel %vm93_vm0, %v152_v14, 0.0  ;;  %v132_v19 = vsel %vm93_vm0, %v120_v15, 0.0  ;;  %v81_v22 = vld [vmem:[%s776_s1 + $0x20] sm:$0xff]  ;;  %v85_v48 = vmul.f32 %v519_v0, %v69_v1  ;;  %v86_v49 = vmul.f32 %v78_v2, %v70_v6 }
   0x8   :  { %v72_v17 = vld [vmem:[%s775_s0 + $0x18] sm:$0xff]  ;;  %v153_v20 = vmul.f32 %v80_v16, %v80_v16  ;;  %v73_v23 = vld [vmem:[%s775_s0 + $0x20] sm:$0xff]  ;;  %v154_v26 = vmul.f32 %v81_v22, %v81_v22  ;;  %v82_v28 = vld [vmem:[%s776_s1 + $0x28] sm:$0xff]  ;;  %v87_v52 = vmul.f32 %v79_v8, %v71_v9  ;;  %vm60_vm1 = vcmask 7168  }
   0x9   :  { %162 = vadd.xlane.f32.xlu1 %v161_v12  ;;  %v121_v21 = vmul.f32 %v72_v17, %v72_v17  ;;  %v122_v27 = vmul.f32 %v73_v23, %v73_v23  ;;  %v74_v29 = vld [vmem:[%s775_s0 + $0x28] sm:$0xff]  ;;  %v155_v32 = vmul.f32 %v82_v28, %v82_v28  ;;  %v83_v34 = vld [vmem:[%s776_s1 + $0x30] sm:$0xff]  ;;  %v84_v40 = vld [vmem:[%s776_s1 + $0x38] sm:$0xff]  ;;  %v94_v50 = vsel %vm93_vm0, %v85_v48, 0.0 }
   0xa   :  { %130 = vadd.xlane.f32.xlu0 %v129_v13  ;;  %v167_v24 = vsel %vm93_vm0, %v153_v20, 0.0  ;;  %v170_v30 = vsel %vm93_vm0, %v154_v26, 0.0  ;;  %v123_v33 = vmul.f32 %v74_v29, %v74_v29  ;;  %v75_v35 = vld [vmem:[%s775_s0 + $0x30] sm:$0xff]  ;;  %v156_v38 = vmul.f32 %v83_v34, %v83_v34  ;;  %v76_v41 = vld [vmem:[%s775_s0 + $0x38] sm:$0xff]  ;;  %s500_s0 = smov [#allocation3]  }
   0xb   :  { %v135_v25 = vsel %vm93_vm0, %v121_v21, 0.0  ;;  %v138_v31 = vsel %vm93_vm0, %v122_v27, 0.0  ;;  %v173_v36 = vsel %vm93_vm0, %v155_v32, 0.0  ;;  %v124_v39 = vmul.f32 %v75_v35, %v75_v35  ;;  %s403_s1 = sshll.u32 %s500_s0, 4  ;;  %s404_s1 = int_to_ptr.vmem [resolvable:$true] %s403_s1 }
   0xc   :  { %v141_v37 = vsel %vm93_vm0, %v123_v33, 0.0  ;;  %v176_v42 = vsel %vm93_vm0, %v156_v38, 0.0  ;;  %v157_v44 = vmul.f32 %v84_v40, %v84_v40  ;;  %v125_v45 = vmul.f32 %v76_v41, %v76_v41  ;;  %s475_s14 = scalar_lea.vmem %s404_s1, 16  ;;  %s479_s15 = scalar_lea.vmem %s404_s1, 32 }
   0xd   :  { %165 = vadd.xlane.f32.xlu1 %v164_v18  ;;  %v144_v43 = vsel %vm93_vm0, %v124_v39, 0.0  ;;  %v97_v51 = vsel %vm93_vm0, %v86_v49, 0.0  ;;  %v88_v53 = vmul.f32 %v80_v16, %v72_v17  ;;  %v100_v54 = vsel %vm93_vm0, %v87_v52, 0.0  ;;  %p476_p0 = scmp.ne.s32.totalorder %s404_s1, %s475_s14  ;;  %p480_p1 = scmp.lt.s32.totalorder %s404_s1, %s404_s1 }
   0xe   :  { %133 = vadd.xlane.f32.xlu0 %v132_v19  ;;  %v179_v46 = vsel %vm93_vm0, %v157_v44, 0.0  ;;  %v147_v47 = vsel %vm93_vm0, %v125_v45, 0.0  ;;  %v89_v56 = vmul.f32 %v81_v22, %v73_v23  ;;  %v90_v57 = vmul.f32 %v82_v28, %v74_v29  ;;  %p481_p2 = scmp.lt.s32.totalorder %s479_s15, %s475_s14 }
   0xf   :  { %v103_v55 = vsel %vm93_vm0, %v88_v53, 0.0  ;;  %v91_v60 = vmul.f32 %v83_v34, %v75_v35  ;;  %v92_v61 = vmul.f32 %v84_v40, %v76_v41  ;;  %v499_v0 = vmov 0.0  }
  0x10   :  { %v106_v58 = vsel %vm93_vm0, %v89_v56, 0.0  ;;  %v109_v59 = vsel %vm93_vm0, %v90_v57, 0.0  ;;  %61 = vst.msk [vmem:[#allocation2] sm:$0xff] %vm60_vm1, %v499_v0  ;;  %62 = vst.msk [vmem:[#allocation2 + $0x8] sm:$0xff] %vm60_vm1, %v499_v0  ;;  %p482_p3 = por %p481_p2, %p480_p1 }
  0x11   :  { %168 = vadd.xlane.f32.xlu1 %v167_v24  ;;  %v112_v62 = vsel %vm93_vm0, %v91_v60, 0.0  ;;  %v115_v63 = vsel %vm93_vm0, %v92_v61, 0.0  ;;  %63 = vst.msk [vmem:[#allocation2 + $0x10] sm:$0xff] %vm60_vm1, %v499_v0  ;;  %64 = vst.msk [vmem:[#allocation2 + $0x18] sm:$0xff] %vm60_vm1, %v499_v0 }
  0x12   :  { %136 = vadd.xlane.f32.xlu0 %v135_v25  ;;  %65 = vst.msk [vmem:[#allocation2 + $0x20] sm:$0xff] %vm60_vm1, %v499_v0  ;;  %66 = vst.msk [vmem:[#allocation2 + $0x28] sm:$0xff] %vm60_vm1, %v499_v0  ;;  %p483_p4 = pnand %p482_p3, %p476_p0 }
  0x13   :  { %67 = vst.msk [vmem:[#allocation2 + $0x30] sm:$0xff] %vm60_vm1, %v499_v0  ;;  %68 = vst.msk [vmem:[#allocation2 + $0x38] sm:$0xff] %vm60_vm1, %v499_v0 }
  0x15   :  { %171 = vadd.xlane.f32.xlu1 %v170_v30 }
  0x16   :  { %139 = vadd.xlane.f32.xlu0 %v138_v31 }
  0x19   :  { %174 = vadd.xlane.f32.xlu1 %v173_v36 }
  0x1a   :  { %142 = vadd.xlane.f32.xlu0 %v141_v37 }
  0x1d   :  { %177 = vadd.xlane.f32.xlu1 %v176_v42 }
  0x1e   :  { %145 = vadd.xlane.f32.xlu0 %v144_v43 }
  0x21   :  { %180 = vadd.xlane.f32.xlu1 %v179_v46 }
  0x22   :  { %148 = vadd.xlane.f32.xlu0 %v147_v47 }
  0x25   :  { %98 = vadd.xlane.f32.xlu1 %v97_v51 }
  0x26   :  { %95 = vadd.xlane.f32.xlu0 %v94_v50 }
  0x29   :  { %104 = vadd.xlane.f32.xlu1 %v103_v55 }
  0x2a   :  { %101 = vadd.xlane.f32.xlu0 %v100_v54 }
  0x2d   :  { %110 = vadd.xlane.f32.xlu1 %v109_v59 }
  0x2e   :  { %107 = vadd.xlane.f32.xlu0 %v106_v58 }
  0x31   :  { %116 = vadd.xlane.f32.xlu1 %v115_v63 }
  0x32   :  { %113 = vadd.xlane.f32.xlu0 %v112_v62 }
  0x92   :  { %v160_v1 = vpop.xlane.xlu1 %159 }
  0x93   :  { %v128_v2 = vpop.xlane.xlu0 %127  ;;  %427 = vrsqrt.f32 %v160_v1  ;;  %vm248_vm2 = vcmp.eq.f32.partialorder %v160_v1, inf  ;;  %vm250_vm3 = vcmp.eq.f32.partialorder %v160_v1, 0.0  ;;  %v251_v10 = vand.u32 2147483648, %v160_v1 }
  0x94   :  { %429 = vrsqrt.f32 %v128_v2  ;;  %vm184_vm4 = vcmp.eq.f32.partialorder %v128_v2, inf  ;;  %vm186_vm5 = vcmp.eq.f32.partialorder %v128_v2, 0.0  ;;  %v187_v14 = vand.u32 2147483648, %v128_v2 }
  0x96   :  { %v163_v3 = vpop.xlane.xlu1 %162 }
  0x97   :  { %v131_v4 = vpop.xlane.xlu0 %130  ;;  %431 = vrsqrt.f32 %v163_v3  ;;  %vm255_vm6 = vcmp.eq.f32.partialorder %v163_v3, inf  ;;  %vm257_vm7 = vcmp.eq.f32.partialorder %v163_v3, 0.0  ;;  %v258_v18 = vand.u32 2147483648, %v163_v3 }
  0x98   :  { %433 = vrsqrt.f32 %v131_v4  ;;  %vm191_vm8 = vcmp.eq.f32.partialorder %v131_v4, inf  ;;  %vm193_vm9 = vcmp.eq.f32.partialorder %v131_v4, 0.0  ;;  %v194_v21 = vand.u32 2147483648, %v131_v4 }
  0x9a   :  { %v601_v5 = vpop.xlane.xlu1 %165 }
  0x9b   :  { %v603_v6 = vpop.xlane.xlu0 %133  ;;  %435 = vrsqrt.f32 %v601_v5  ;;  %vm262_vm10 = vcmp.eq.f32.partialorder %v601_v5, inf  ;;  %v265_v22 = vand.u32 2147483648, %v601_v5  ;;  %vm264_vm11 = vcmp.eq.f32.partialorder %v601_v5, 0.0 }
  0x9c   :  { %437 = vrsqrt.f32 %v603_v6  ;;  %vm198_vm12 = vcmp.eq.f32.partialorder %v603_v6, inf  ;;  %v201_v29 = vand.u32 2147483648, %v603_v6  ;;  %vm200_vm13 = vcmp.eq.f32.partialorder %v603_v6, 0.0 }
  0x9d   :  { %v428_v7 = vpop.eup %427 }
  0x9e   :  { %v430_v8 = vpop.eup %429  ;;  %v247_v9 = vmul.f32 %v428_v7, %v160_v1  ;;  %v607_v11 = vpop.xlane.xlu1 %168 }
  0x9f   :  { %v609_v12 = vpop.xlane.xlu0 %136  ;;  %v183_v13 = vmul.f32 %v430_v8, %v128_v2  ;;  %439 = vrsqrt.f32 %v607_v11  ;;  %vm269_vm14 = vcmp.eq.f32.partialorder %v607_v11, inf  ;;  %v272_v32 = vand.u32 2147483648, %v607_v11 }
  0xa0   :  { %v249_v15 = vsel %vm248_vm2, %v160_v1, %v247_v9  ;;  %441 = vrsqrt.f32 %v609_v12  ;;  %vm205_vm15 = vcmp.eq.f32.partialorder %v609_v12, inf  ;;  %v208_v35 = vand.u32 2147483648, %v609_v12 }
  0xa1   :  { %v432_v16 = vpop.eup %431  ;;  %v185_v17 = vsel %vm184_vm4, %v128_v2, %v183_v13  ;;  %v252_v25 = vsel %vm250_vm3, %v251_v10, %v249_v15  ;;  %vm271_vm0 = vcmp.eq.f32.partialorder %v607_v11, 0.0  ;;  %vm207_vm2 = vcmp.eq.f32.partialorder %v609_v12, 0.0 }
  0xa2   :  { %v434_v19 = vpop.eup %433  ;;  %v254_v20 = vmul.f32 %v432_v16, %v163_v3  ;;  %v615_v23 = vpop.xlane.xlu1 %171  ;;  %v188_v26 = vsel %vm186_vm5, %v187_v14, %v185_v17  ;;  %v302_v39 = vmax.f32 %v252_v25, 1e-12 }
  0xa3   :  { %v617_v24 = vpop.xlane.xlu0 %139  ;;  %v190_v27 = vmul.f32 %v434_v19, %v131_v4  ;;  %443 = vrsqrt.f32 %v615_v23  ;;  %v238_v38 = vmax.f32 %v188_v26, 1e-12  ;;  %vm276_vm3 = vcmp.eq.f32.partialorder %v615_v23, inf }
  0xa4   :  { %v256_v28 = vsel %vm255_vm6, %v163_v3, %v254_v20  ;;  %445 = vrsqrt.f32 %v617_v24  ;;  %vm278_vm4 = vcmp.eq.f32.partialorder %v615_v23, 0.0  ;;  %v279_v43 = vand.u32 2147483648, %v615_v23 }
  0xa5   :  { %v436_v30 = vpop.eup %435  ;;  %v192_v31 = vsel %vm191_vm8, %v131_v4, %v190_v27  ;;  %v259_v40 = vsel %vm257_vm7, %v258_v18, %v256_v28  ;;  %vm212_vm5 = vcmp.eq.f32.partialorder %v617_v24, inf  ;;  %vm214_vm6 = vcmp.eq.f32.partialorder %v617_v24, 0.0 }
  0xa6   :  { %v438_v33 = vpop.eup %437  ;;  %v261_v34 = vmul.f32 %v436_v30, %v601_v5  ;;  %v634_v36 = vpop.xlane.xlu1 %174  ;;  %v195_v41 = vsel %vm193_vm9, %v194_v21, %v192_v31  ;;  %v215_v46 = vand.u32 2147483648, %v617_v24  ;;  %v318_v51 = vmul.f32 %v302_v39, %v238_v38 }
  0xa7   :  { %v636_v37 = vpop.xlane.xlu0 %142  ;;  %v197_v42 = vmul.f32 %v438_v33, %v603_v6  ;;  %447 = vrsqrt.f32 %v634_v36  ;;  %v303_v52 = vmax.f32 %v259_v40, 1e-12  ;;  %v239_v53 = vmax.f32 %v195_v41, 1e-12  ;;  %v310_v40 = vld [vmem:[#allocation2] sm:$0xff] }
  0xa8   :  { %449 = vrsqrt.f32 %v636_v37  ;;  %v263_v45 = vsel %vm262_vm10, %v601_v5, %v261_v34  ;;  %vm283_vm7 = vcmp.eq.f32.partialorder %v634_v36, inf  ;;  %vm285_vm8 = vcmp.eq.f32.partialorder %v634_v36, 0.0 }
  0xa9   :  { %v440_v44 = vpop.eup %439  ;;  %v199_v54 = vsel %vm198_vm12, %v603_v6, %v197_v42  ;;  %v266_v56 = vsel %vm264_vm11, %v265_v22, %v263_v45  ;;  %v286_v57 = vand.u32 2147483648, %v634_v36  ;;  %vm219_vm9 = vcmp.eq.f32.partialorder %v636_v37, inf }
  0xaa   :  { %v442_v47 = vpop.eup %441  ;;  %v268_v48 = vmul.f32 %v440_v44, %v607_v11  ;;  %v655_v49 = vpop.xlane.xlu1 %177  ;;  %vm221_vm10 = vcmp.eq.f32.partialorder %v636_v37, 0.0  ;;  %v222_v61 = vand.u32 2147483648, %v636_v37  ;;  %v202_v63 = vsel %vm200_vm13, %v201_v29, %v199_v54 }
  0xab   :  { %v657_v50 = vpop.xlane.xlu0 %145  ;;  %v204_v55 = vmul.f32 %v442_v47, %v609_v12  ;;  %451 = vrsqrt.f32 %v655_v49  ;;  %v319_v3 = vmul.f32 %v303_v52, %v239_v53  ;;  %vm290_vm11 = vcmp.eq.f32.partialorder %v655_v49, inf }
  0xac   :  { %453 = vrsqrt.f32 %v657_v50  ;;  %v270_v59 = vsel %vm269_vm14, %v607_v11, %v268_v48  ;;  %v293_v5 = vand.u32 2147483648, %v655_v49  ;;  %vm292_vm12 = vcmp.eq.f32.partialorder %v655_v49, 0.0 }
  0xad   :  { %v444_v58 = vpop.eup %443  ;;  %v206_v60 = vsel %vm205_vm15, %v609_v12, %v204_v55  ;;  %455 = vrcp.f32 %v318_v51  ;;  %v273_v6 = vsel %vm271_vm0, %v272_v32, %v270_v59  ;;  %vm226_vm13 = vcmp.eq.f32.partialorder %v657_v50, inf }
  0xae   :  { %v446_v62 = vpop.eup %445  ;;  %v275_v0 = vmul.f32 %v444_v58, %v615_v23  ;;  %v682_v1 = vpop.xlane.xlu1 %180  ;;  %v209_v7 = vsel %vm207_vm2, %v208_v35, %v206_v60  ;;  %vm228_vm14 = vcmp.eq.f32.partialorder %v657_v50, 0.0  ;;  %v240_v15 = vmax.f32 %v202_v63, 1e-12 }
  0xaf   :  { %v684_v2 = vpop.xlane.xlu0 %148  ;;  %v211_v4 = vmul.f32 %v446_v62, %v617_v24  ;;  %457 = vrsqrt.f32 %v682_v1  ;;  %v304_v17 = vmax.f32 %v266_v56, 1e-12  ;;  %v305_v18 = vmax.f32 %v273_v6, 1e-12 }
  0xb0   :  { %v277_v8 = vsel %vm276_vm3, %v615_v23, %v275_v0  ;;  %459 = vrsqrt.f32 %v684_v2  ;;  %v241_v19 = vmax.f32 %v209_v7, 1e-12  ;;  %v229_v21 = vand.u32 2147483648, %v657_v50  ;;  %v312_v7 = vld [vmem:[#allocation2 + $0x10] sm:$0xff] }
  0xb1   :  { %v448_v9 = vpop.eup %447  ;;  %v280_v10 = vsel %vm278_vm4, %v279_v43, %v277_v8  ;;  %v213_v11 = vsel %vm212_vm5, %v617_v24, %v211_v4  ;;  %461 = vrcp.f32 %v319_v3  ;;  %v320_v27 = vmul.f32 %v304_v17, %v240_v15 }
  0xb2   :  { %v450_v12 = vpop.eup %449  ;;  %v216_v13 = vsel %vm214_vm6, %v215_v46, %v213_v11  ;;  %v282_v14 = vmul.f32 %v448_v9, %v634_v36  ;;  %v306_v23 = vmax.f32 %v280_v10, 1e-12  ;;  %v321_v28 = vmul.f32 %v305_v18, %v241_v19  ;;  %v99_v48 = vpop.xlane.xlu1 %98 }
  0xb3   :  { %v218_v16 = vmul.f32 %v450_v12, %v636_v37  ;;  %v242_v22 = vmax.f32 %v216_v13, 1e-12  ;;  %v96_v32 = vpop.xlane.xlu0 %95  ;;  %vm297_vm15 = vcmp.eq.f32.partialorder %v682_v1, inf  ;;  %463 = vrcp.f32 %v320_v27  ;;  %v314_v13 = vld [vmem:[#allocation2 + $0x20] sm:$0xff] }
  0xb4   :  { %v284_v20 = vsel %vm283_vm7, %v634_v36, %v282_v14  ;;  %vm299_vm0 = vcmp.eq.f32.partialorder %v682_v1, 0.0  ;;  %465 = vrcp.f32 %v321_v28  ;;  %vm233_vm2 = vcmp.eq.f32.partialorder %v684_v2, inf }
  0xb5   :  { %v452_v25 = vpop.eup %451  ;;  %v287_v24 = vsel %vm285_vm8, %v286_v57, %v284_v20  ;;  %v220_v26 = vsel %vm219_vm9, %v636_v37, %v218_v16  ;;  %v322_v33 = vmul.f32 %v306_v23, %v242_v22  ;;  %v300_v37 = vand.u32 2147483648, %v682_v1  ;;  %v311_v57 = vld [vmem:[#allocation2 + $0x8] sm:$0xff] }
  0xb6   :  { %v454_v29 = vpop.eup %453  ;;  %v223_v30 = vsel %vm221_vm10, %v222_v61, %v220_v26  ;;  %v289_v31 = vmul.f32 %v452_v25, %v655_v49  ;;  %v307_v34 = vmax.f32 %v287_v24, 1e-12  ;;  %vm235_vm3 = vcmp.eq.f32.partialorder %v684_v2, 0.0  ;;  %v315_v20 = vld [vmem:[#allocation2 + $0x28] sm:$0xff]  ;;  %v316_v24 = vld [vmem:[#allocation2 + $0x30] sm:$0xff] }
  0xb7   :  { %v225_v35 = vmul.f32 %v454_v29, %v657_v50  ;;  %v243_v36 = vmax.f32 %v223_v30, 1e-12  ;;  %v456_v38 = vpop.eup %455  ;;  %467 = vrcp.f32 %v322_v33  ;;  %v102_v61 = vpop.xlane.xlu0 %101  ;;  %v317_v33 = vld [vmem:[#allocation2 + $0x38] sm:$0xff]  ;;  %vm395_vm4 = vcmask 0  }
  0xb8   :  { %v291_v39 = vsel %vm290_vm11, %v655_v49, %v289_v31  ;;  %v327_v44 = vmul.f32 %v456_v38, %v96_v32 }
  0xb9   :  { %v458_v41 = vpop.eup %457  ;;  %v294_v42 = vsel %vm292_vm12, %v293_v5, %v291_v39  ;;  %v227_v43 = vsel %vm226_vm13, %v657_v50, %v225_v35  ;;  %v323_v51 = vmul.f32 %v307_v34, %v243_v36  ;;  %v236_v50 = vand.u32 2147483648, %v684_v2  ;;  %v105_v5 = vpop.xlane.xlu1 %104 }
  0xba   :  { %v460_v45 = vpop.eup %459  ;;  %v230_v46 = vsel %vm228_vm14, %v229_v21, %v227_v43  ;;  %v296_v47 = vmul.f32 %v458_v41, %v682_v1  ;;  %v308_v52 = vmax.f32 %v294_v42, 1e-12  ;;  %v342_v49 = vadd.f32 %v327_v44, %v310_v40 }
  0xbb   :  { %v232_v53 = vmul.f32 %v460_v45, %v684_v2  ;;  %v244_v54 = vmax.f32 %v230_v46, 1e-12  ;;  %v462_v55 = vpop.eup %461  ;;  %469 = vrcp.f32 %v323_v51  ;;  %v108_v8 = vpop.xlane.xlu0 %107 }
  0xbc   :  { %v298_v56 = vsel %vm297_vm15, %v682_v1, %v296_v47  ;;  %351 = vst.msk [vmem:[#allocation2] sm:$0xff] %vm60_vm1, %v342_v49  ;;  %v329_v60 = vmul.f32 %v462_v55, %v99_v48 }
  0xbd   :  { %v301_v58 = vsel %vm299_vm0, %v300_v37, %v298_v56  ;;  %v234_v59 = vsel %vm233_vm2, %v684_v2, %v232_v53  ;;  %v324_v62 = vmul.f32 %v308_v52, %v244_v54  ;;  %v464_v6 = vpop.eup %463  ;;  %v313_v2 = vld [vmem:[#allocation2 + $0x18] sm:$0xff]  ;;  %v111_v16 = vpop.xlane.xlu1 %110 }
  0xbe   :  { %v237_v63 = vsel %vm235_vm3, %v236_v50, %v234_v59  ;;  %v309_v0 = vmax.f32 %v301_v58, 1e-12  ;;  %v343_v3 = vadd.f32 %v329_v60, %v311_v57  ;;  %v466_v9 = vpop.eup %465  ;;  %v331_v10 = vmul.f32 %v464_v6, %v102_v61 }
  0xbf   :  { %471 = vrcp.f32 %v324_v62  ;;  %v245_v4 = vmax.f32 %v237_v63, 1e-12  ;;  %v333_v12 = vmul.f32 %v466_v9, %v105_v5  ;;  %v114_v22 = vpop.xlane.xlu0 %113 }
  0xc0   :  { %352 = vst.msk [vmem:[#allocation2 + $0x8] sm:$0xff] %vm60_vm1, %v343_v3  ;;  %v344_v14 = vadd.f32 %v331_v10, %v312_v7 }
  0xc1   :  { %v325_v1 = vmul.f32 %v309_v0, %v245_v4  ;;  %v468_v11 = vpop.eup %467  ;;  %v345_v17 = vadd.f32 %v333_v12, %v313_v2  ;;  %v117_v28 = vpop.xlane.xlu1 %116 }
  0xc2   :  { %v335_v15 = vmul.f32 %v468_v11, %v108_v8  ;;  %353 = vst.msk [vmem:[#allocation2 + $0x10] sm:$0xff] %vm60_vm1, %v344_v14 }
  0xc3   :  { %473 = vrcp.f32 %v325_v1  ;;  %354 = vst.msk [vmem:[#allocation2 + $0x18] sm:$0xff] %vm60_vm1, %v345_v17  ;;  %v362_v29 = vld [vmem:[#allocation2] sm:$0xff] }
  0xc4   :  { %v346_v19 = vadd.f32 %v335_v15, %v314_v13  ;;  %v370_v38 = vsel %vm60_vm1, %v362_v29, 0.0 }
  0xc5   :  { %v470_v18 = vpop.eup %469 }
  0xc6   :  { %v337_v21 = vmul.f32 %v470_v18, %v111_v16  ;;  %355 = vst.msk [vmem:[#allocation2 + $0x20] sm:$0xff] %vm60_vm1, %v346_v19 }
  0xc7   :  { %v363_v26 = vld [vmem:[#allocation2 + $0x8] sm:$0xff] }
  0xc8   :  { %v347_v25 = vadd.f32 %v337_v21, %v315_v20  ;;  %v371_v31 = vsel %vm60_vm1, %v363_v26, 0.0 }
  0xc9   :  { %v472_v23 = vpop.eup %471  ;;  %v364_v34 = vld [vmem:[#allocation2 + $0x10] sm:$0xff]  ;;  %v372_v40 = vadd.f32 %v371_v31, %v370_v38 }
  0xca   :  { %v339_v27 = vmul.f32 %v472_v23, %v114_v22  ;;  %356 = vst.msk [vmem:[#allocation2 + $0x28] sm:$0xff] %vm60_vm1, %v347_v25  ;;  %v365_v36 = vld [vmem:[#allocation2 + $0x18] sm:$0xff]  ;;  %v373_v39 = vsel %vm60_vm1, %v364_v34, 0.0 }
  0xcb   :  { %v375_v42 = vsel %vm60_vm1, %v365_v36, 0.0  ;;  %v374_v43 = vadd.f32 %v373_v39, %v372_v40 }
  0xcc   :  { %v348_v30 = vadd.f32 %v339_v27, %v316_v24 }
  0xcd   :  { %v474_v32 = vpop.eup %473  ;;  %v366_v37 = vld [vmem:[#allocation2 + $0x20] sm:$0xff]  ;;  %v376_v46 = vadd.f32 %v375_v42, %v374_v43 }
  0xce   :  { %357 = vst.msk [vmem:[#allocation2 + $0x30] sm:$0xff] %vm60_vm1, %v348_v30  ;;  %v341_v35 = vmul.f32 %v474_v32, %v117_v28  ;;  %v377_v45 = vsel %vm60_vm1, %v366_v37, 0.0 }
  0xcf   :  { %v378_v51 = vadd.f32 %v377_v45, %v376_v46 }
  0xd0   :  { %v349_v41 = vadd.f32 %v341_v35, %v317_v33 }
  0xd1   :  { %v367_v44 = vld [vmem:[#allocation2 + $0x28] sm:$0xff] }
  0xd2   :  { %358 = vst.msk [vmem:[#allocation2 + $0x38] sm:$0xff] %vm60_vm1, %v349_v41  ;;  %v379_v47 = vsel %vm60_vm1, %v367_v44, 0.0 }
  0xd3   :  { %v380_v53 = vadd.f32 %v379_v47, %v378_v51 }
  0xd5   :  { %v368_v48 = vld [vmem:[#allocation2 + $0x30] sm:$0xff] }
  0xd6   :  { %v381_v52 = vsel %vm60_vm1, %v368_v48, 0.0 }
  0xd7   :  { %v382_v54 = vadd.f32 %v381_v52, %v380_v53 }
  0xd9   :  { %v369_v49 = vld [vmem:[#allocation2 + $0x38] sm:$0xff] }
  0xda   :  { %v383_v55 = vsel %vm60_vm1, %v369_v49, 0.0 }
  0xdb   :  { %v384_v56 = vadd.f32 %v383_v55, %v382_v54 }
  0xdd   :  { %385 = vadd.xlane.f32.xlu0 %v384_v56 }
 0x16a   :  { %v386_v50 = vpop.xlane.xlu0 %385 }
 0x16b   :  { %v387_v57 = vrot.slane %v386_v50, 4 }
 0x16d   :  { %v388_v58 = vadd.f32 %v387_v57, %v386_v50 }
 0x16f   :  { %v389_v59 = vrot.slane %v388_v58, 2 }
 0x171   :  { %v390_v60 = vadd.f32 %v389_v59, %v388_v58 }
 0x173   :  { %v391_v61 = vrot.slane %v390_v60, 1 }
 0x175   :  { %v392_v62 = vadd.f32 %v391_v61, %v390_v60 }
 0x177   :  { %423 = vpush %v392_v62 }
 0x1a8   :  { %s424_s13 = spop %423 }
 0x1a9   :  { %v394_v63 = vstv %s424_s13 }
 0x1aa   :  { %396 = vst.msk [vmem:[#allocation3] sm:$0x1] %vm395_vm4, %v394_v63 }
 0x1ab   :  { %486 = shalt.err (!%p483_p4)
}
 0x1ac   :  { %s487_s18 = scalar_lea.hbm %s777_s2, 16 }
 0x1ad   :  { %p488_p5 = scmp.ne.s32.totalorder %s777_s2, %s487_s18  ;;  %p491_p6 = scmp.lt.u32.totalorder %s487_s18, %s777_s2 }
 0x1af   :  { %p493_p7 = pnand %p491_p6, %p488_p5 }
 0x1b1   :  { %496 = shalt.err (!%p493_p7)
}
 0x1b2   :  { %406 = dma.vmem_to_hbm [thread:$0]  %s404_s1, 16, %s777_s2, [#allocation4]  }
 0x1b3   :  { %497 = dma.done.wait [#allocation4], 16  }
 0x1b4   :  { %498 = vsyncadd [#allocation4], 4294967280 }
 0x1b5   :  { %410 = vsyncpa [#allocation4], 1 }

// kernel: csmkd_loss.3
= control target key start
LH: loop header
LB: loop body
LE: loop exit
PB: predicated region body
PF: predicated region fallthrough
CT: control target
= control target key end

     0   :  { %vm69_vm0 = vcmask 261120   ;;  %s276_s0 = inlined_call_operand.vmem [shape: f32[16,32], index: 0, kind: input, shape index: {}]   ;;  %s277_s1 = inlined_call_operand.vmem [shape: f32[16,32], index: 1, kind: input, shape index: {}]   ;;  %s278_s2 = inlined_call_operand.hbm [shape: f32[1,1], index: 2, kind: output, shape index: {}]  }
   0x1   :  { %v65_v0 = vld [vmem:[%s277_s1] sm:$0xff]  ;;  %v66_v2 = vld [vmem:[%s277_s1 + $0x8] sm:$0xff] }
   0x2   :  { %v63_v1 = vld [vmem:[%s276_s0] sm:$0xff]  ;;  %v84_v3 = vmul.f32 %v65_v0, %v65_v0  ;;  %v85_v5 = vmul.f32 %v66_v2, %v66_v2  ;;  %v64_v6 = vld [vmem:[%s276_s0 + $0x8] sm:$0xff] }
   0x3   :  { %v76_v4 = vmul.f32 %v63_v1, %v63_v1 }
   0x4   :  { %7 = vsyncpa [#allocation4], 0  ;;  %v77_v7 = vmul.f32 %v64_v6, %v64_v6  ;;  %v86_v8 = vsel %vm69_vm0, %v84_v3, 0.0  ;;  %v89_v10 = vsel %vm69_vm0, %v85_v5, 0.0  ;;  %v67_v12 = vmul.f32 %v65_v0, %v63_v1  ;;  %s224_s0 = smov [#allocation3]  }
   0x5   :  { %v78_v9 = vsel %vm69_vm0, %v76_v4, 0.0  ;;  %87 = vadd.xlane.f32.xlu1 %v86_v8  ;;  %v68_v13 = vmul.f32 %v66_v2, %v64_v6  ;;  %vm60_vm1 = vcmask 7168   ;;  %v223_v16 = vmov 0.0   ;;  %s163_s1 = sshll.u32 %s224_s0, 4  ;;  %s164_s1 = int_to_ptr.vmem [resolvable:$true] %s163_s1 }
   0x6   :  { %79 = vadd.xlane.f32.xlu0 %v78_v9  ;;  %v81_v11 = vsel %vm69_vm0, %v77_v7, 0.0  ;;  %v70_v14 = vsel %vm69_vm0, %v67_v12, 0.0  ;;  %61 = vst.msk [vmem:[#allocation2] sm:$0xff] %vm60_vm1, %v223_v16  ;;  %62 = vst.msk [vmem:[#allocation2 + $0x8] sm:$0xff] %vm60_vm1, %v223_v16  ;;  %vm155_vm10 = vcmask 0   ;;  %s199_s18 = scalar_lea.vmem %s164_s1, 16  ;;  %p204_p1 = scmp.lt.s32.totalorder %s164_s1, %s164_s1 }
   0x7   :  { %v73_v15 = vsel %vm69_vm0, %v68_v13, 0.0  ;;  %p200_p0 = scmp.ne.s32.totalorder %s164_s1, %s199_s18  ;;  %s203_s19 = scalar_lea.vmem %s164_s1, 32 }
   0x8   :  { %p205_p2 = scmp.lt.s32.totalorder %s203_s19, %s199_s18 }
   0x9   :  { %90 = vadd.xlane.f32.xlu1 %v89_v10 }
   0xa   :  { %82 = vadd.xlane.f32.xlu0 %v81_v11  ;;  %p206_p3 = por %p205_p2, %p204_p1 }
   0xc   :  { %p207_p4 = pnand %p206_p3, %p200_p0 }
   0xd   :  { %74 = vadd.xlane.f32.xlu1 %v73_v15  ;;  %v124_v49 = vld [vmem:[#allocation2] sm:$0xff]  ;;  %v125_v54 = vld [vmem:[#allocation2 + $0x8] sm:$0xff] }
   0xe   :  { %71 = vadd.xlane.f32.xlu0 %v70_v14 }
  0x92   :  { %v88_v17 = vpop.xlane.xlu1 %87 }
  0x93   :  { %v80_v18 = vpop.xlane.xlu0 %79  ;;  %187 = vrsqrt.f32 %v88_v17  ;;  %vm110_vm2 = vcmp.eq.f32.partialorder %v88_v17, inf  ;;  %v113_v24 = vand.u32 2147483648, %v88_v17  ;;  %vm112_vm3 = vcmp.eq.f32.partialorder %v88_v17, 0.0 }
  0x94   :  { %189 = vrsqrt.f32 %v80_v18  ;;  %vm94_vm4 = vcmp.eq.f32.partialorder %v80_v18, inf  ;;  %v97_v27 = vand.u32 2147483648, %v80_v18  ;;  %vm96_vm5 = vcmp.eq.f32.partialorder %v80_v18, 0.0 }
  0x96   :  { %v91_v19 = vpop.xlane.xlu1 %90 }
  0x97   :  { %v83_v20 = vpop.xlane.xlu0 %82  ;;  %191 = vrsqrt.f32 %v91_v19  ;;  %vm117_vm6 = vcmp.eq.f32.partialorder %v91_v19, inf  ;;  %v120_v35 = vand.u32 2147483648, %v91_v19  ;;  %vm119_vm7 = vcmp.eq.f32.partialorder %v91_v19, 0.0 }
  0x98   :  { %193 = vrsqrt.f32 %v83_v20  ;;  %vm101_vm8 = vcmp.eq.f32.partialorder %v83_v20, inf  ;;  %v104_v39 = vand.u32 2147483648, %v83_v20  ;;  %vm103_vm9 = vcmp.eq.f32.partialorder %v83_v20, 0.0 }
  0x9a   :  { %v75_v51 = vpop.xlane.xlu1 %74 }
  0x9b   :  { %v72_v47 = vpop.xlane.xlu0 %71 }
  0x9d   :  { %v188_v21 = vpop.eup %187 }
  0x9e   :  { %v190_v22 = vpop.eup %189  ;;  %v109_v23 = vmul.f32 %v188_v21, %v88_v17 }
  0x9f   :  { %v93_v25 = vmul.f32 %v190_v22, %v80_v18 }
  0xa0   :  { %v111_v26 = vsel %vm110_vm2, %v88_v17, %v109_v23 }
  0xa1   :  { %v192_v28 = vpop.eup %191  ;;  %v114_v29 = vsel %vm112_vm3, %v113_v24, %v111_v26  ;;  %v95_v30 = vsel %vm94_vm4, %v80_v18, %v93_v25 }
  0xa2   :  { %v194_v31 = vpop.eup %193  ;;  %v98_v32 = vsel %vm96_vm5, %v97_v27, %v95_v30  ;;  %v116_v33 = vmul.f32 %v192_v28, %v91_v19  ;;  %v122_v34 = vmax.f32 %v114_v29, 1e-12 }
  0xa3   :  { %v100_v36 = vmul.f32 %v194_v31, %v83_v20  ;;  %v106_v37 = vmax.f32 %v98_v32, 1e-12 }
  0xa4   :  { %v118_v38 = vsel %vm117_vm6, %v91_v19, %v116_v33 }
  0xa5   :  { %v121_v40 = vsel %vm119_vm7, %v120_v35, %v118_v38  ;;  %v102_v41 = vsel %vm101_vm8, %v83_v20, %v100_v36  ;;  %v126_v42 = vmul.f32 %v122_v34, %v106_v37 }
  0xa6   :  { %v105_v43 = vsel %vm103_vm9, %v104_v39, %v102_v41  ;;  %v123_v44 = vmax.f32 %v121_v40, 1e-12 }
  0xa7   :  { %195 = vrcp.f32 %v126_v42  ;;  %v107_v45 = vmax.f32 %v105_v43, 1e-12 }
  0xa9   :  { %v127_v46 = vmul.f32 %v123_v44, %v107_v45 }
  0xab   :  { %197 = vrcp.f32 %v127_v46 }
  0xb1   :  { %v196_v48 = vpop.eup %195 }
  0xb2   :  { %v129_v50 = vmul.f32 %v196_v48, %v72_v47 }
  0xb4   :  { %v132_v52 = vadd.f32 %v129_v50, %v124_v49 }
  0xb5   :  { %v198_v53 = vpop.eup %197 }
  0xb6   :  { %135 = vst.msk [vmem:[#allocation2] sm:$0xff] %vm60_vm1, %v132_v52  ;;  %v131_v55 = vmul.f32 %v198_v53, %v75_v51 }
  0xb8   :  { %v133_v56 = vadd.f32 %v131_v55, %v125_v54 }
  0xba   :  { %136 = vst.msk [vmem:[#allocation2 + $0x8] sm:$0xff] %vm60_vm1, %v133_v56 }
  0xbd   :  { %v140_v57 = vld [vmem:[#allocation2] sm:$0xff] }
  0xbe   :  { %v142_v59 = vsel %vm60_vm1, %v140_v57, 0.0 }
  0xc1   :  { %v141_v58 = vld [vmem:[#allocation2 + $0x8] sm:$0xff] }
  0xc2   :  { %v143_v60 = vsel %vm60_vm1, %v141_v58, 0.0 }
  0xc3   :  { %v144_v61 = vadd.f32 %v143_v60, %v142_v59 }
  0xc5   :  { %145 = vadd.xlane.f32.xlu0 %v144_v61 }
 0x152   :  { %v146_v62 = vpop.xlane.xlu0 %145 }
 0x153   :  { %v147_v63 = vrot.slane %v146_v62, 4 }
 0x155   :  { %v148_v0 = vadd.f32 %v147_v63, %v146_v62 }
 0x157   :  { %v149_v1 = vrot.slane %v148_v0, 2 }
 0x159   :  { %v150_v2 = vadd.f32 %v149_v1, %v148_v0 }
 0x15b   :  { %v151_v3 = vrot.slane %v150_v2, 1 }
 0x15d   :  { %v152_v4 = vadd.f32 %v151_v3, %v150_v2 }
 0x15f   :  { %183 = vpush %v152_v4 }
 0x190   :  { %s184_s17 = spop %183 }
 0x191   :  { %v154_v5 = vstv %s184_s17 }
 0x192   :  { %156 = vst.msk [vmem:[#allocation3] sm:$0x1] %vm155_vm10, %v154_v5 }
 0x193   :  { %210 = shalt.err (!%p207_p4)
}
 0x194   :  { %s211_s22 = scalar_lea.hbm %s278_s2, 16 }
 0x195   :  { %p212_p5 = scmp.ne.s32.totalorder %s278_s2, %s211_s22  ;;  %p215_p6 = scmp.lt.u32.totalorder %s211_s22, %s278_s2 }
 0x197   :  { %p217_p7 = pnand %p215_p6, %p212_p5 }
 0x199   :  { %220 = shalt.err (!%p217_p7)
}
 0x19a   :  { %166 = dma.vmem_to_hbm [thread:$0]  %s164_s1, 16, %s278_s2, [#allocation4]  }
 0x19b   :  { %221 = dma.done.wait [#allocation4], 16  }
 0x19c   :  { %222 = vsyncadd [#allocation4], 4294967280 }
 0x19d   :  { %170 = vsyncpa [#allocation4], 1 }

// kernel: csmkd_loss.5
= control target key start
LH: loop header
LB: loop body
LE: loop exit
PB: predicated region body
PF: predicated region fallthrough
CT: control target
= control target key end

     0   :  { %s364_s0 = inlined_call_operand.vmem [shape: f32[16,512], index: 0, kind: input, shape index: {}]   ;;  %s365_s1 = inlined_call_operand.vmem [shape: f32[16,512], index: 1, kind: input, shape index: {}]   ;;  %s366_s2 = inlined_call_operand.hbm [shape: f32[1,1], index: 2, kind: output, shape index: {}]  }
   0x1   :  { %v74_v0 = vld [vmem:[%s364_s0] sm:$0xff]  ;;  %v75_v1 = vld [vmem:[%s364_s0 + $0x8] sm:$0xff]  ;;  %v76_v2 = vld [vmem:[%s364_s0 + $0x10] sm:$0xff] }
   0x2   :  { %v77_v3 = vld [vmem:[%s364_s0 + $0x18] sm:$0xff]  ;;  %229 = vrcp.f32 %v74_v0  ;;  %v78_v4 = vld [vmem:[%s364_s0 + $0x20] sm:$0xff]  ;;  %v79_v5 = vld [vmem:[%s364_s0 + $0x28] sm:$0xff] }
   0x3   :  { %231 = vrcp.f32 %v75_v1  ;;  %v80_v6 = vld [vmem:[%s364_s0 + $0x30] sm:$0xff]  ;;  %v81_v7 = vld [vmem:[%s364_s0 + $0x38] sm:$0xff] }
   0x4   :  { %233 = vrcp.f32 %v76_v2 }
   0x5   :  { %235 = vrcp.f32 %v77_v3 }
   0x6   :  { %237 = vrcp.f32 %v78_v4 }
   0x7   :  { %7 = vsyncpa [#allocation4], 0  ;;  %239 = vrcp.f32 %v79_v5  ;;  %v82_v8 = vld [vmem:[%s365_s1] sm:$0xff]  ;;  %v83_v9 = vld [vmem:[%s365_s1 + $0x8] sm:$0xff]  ;;  %vm198_vm8 = vcmask 0  }
   0x8   :  { %241 = vrcp.f32 %v80_v6  ;;  %v84_v10 = vld [vmem:[%s365_s1 + $0x10] sm:$0xff]  ;;  %v85_v12 = vld [vmem:[%s365_s1 + $0x18] sm:$0xff]  ;;  %vm90_vm0 = vcmp.gt.f32.partialorder %v82_v8, 0.0  ;;  %v86_v14 = vld [vmem:[%s365_s1 + $0x20] sm:$0xff]  ;;  %vm91_vm1 = vcmp.gt.f32.partialorder %v83_v9, 0.0 }
   0x9   :  { %243 = vrcp.f32 %v81_v7  ;;  %v87_v17 = vld [vmem:[%s365_s1 + $0x28] sm:$0xff]  ;;  %vm92_vm2 = vcmp.gt.f32.partialorder %v84_v10, 0.0  ;;  %v88_v20 = vld [vmem:[%s365_s1 + $0x30] sm:$0xff]  ;;  %vm93_vm3 = vcmp.gt.f32.partialorder %v85_v12, 0.0  ;;  %v89_v24 = vld [vmem:[%s365_s1 + $0x38] sm:$0xff]  ;;  %vm94_vm4 = vcmp.gt.f32.partialorder %v86_v14, 0.0 }
   0xa   :  { %vm95_vm5 = vcmp.gt.f32.partialorder %v87_v17, 0.0  ;;  %vm96_vm6 = vcmp.gt.f32.partialorder %v88_v20, 0.0  ;;  %vm97_vm7 = vcmp.gt.f32.partialorder %v89_v24, 0.0  ;;  %s285_s1 = smov [#allocation3]  }
   0xb   :  { %s206_s12 = sshll.u32 %s285_s1, 4  ;;  %s207_s12 = int_to_ptr.vmem [resolvable:$true] %s206_s12 }
   0xc   :  { %v230_v11 = vpop.eup %229  ;;  %s261_s14 = scalar_lea.vmem %s207_s12, 16  ;;  %s265_s15 = scalar_lea.vmem %s207_s12, 32 }
   0xd   :  { %v232_v13 = vpop.eup %231  ;;  %v99_v15 = vmul.f32 %v230_v11, %v82_v8  ;;  %p262_p0 = scmp.ne.s32.totalorder %s207_s12, %s261_s14  ;;  %p266_p1 = scmp.lt.s32.totalorder %s207_s12, %s207_s12 }
   0xe   :  { %v234_v16 = vpop.eup %233  ;;  %v101_v18 = vmul.f32 %v232_v13, %v83_v9  ;;  %p267_p2 = scmp.lt.s32.totalorder %s265_s15, %s261_s14 }
   0xf   :  { %v236_v19 = vpop.eup %235  ;;  %v103_v21 = vmul.f32 %v234_v16, %v84_v10  ;;  %v114_v22 = vsel %vm90_vm0, %v99_v15, 1.0 }
  0x10   :  { %v238_v23 = vpop.eup %237  ;;  %v105_v25 = vmul.f32 %v236_v19, %v85_v12  ;;  %v115_v26 = vsel %vm91_vm1, %v101_v18, 1.0  ;;  %245 = vlog2.f32 %v114_v22  ;;  %p268_p3 = por %p267_p2, %p266_p1 }
  0x11   :  { %v240_v27 = vpop.eup %239  ;;  %v107_v28 = vmul.f32 %v238_v23, %v86_v14  ;;  %v116_v29 = vsel %vm92_vm2, %v103_v21, 1.0  ;;  %247 = vlog2.f32 %v115_v26 }
  0x12   :  { %v242_v30 = vpop.eup %241  ;;  %v109_v31 = vmul.f32 %v240_v27, %v87_v17  ;;  %v117_v32 = vsel %vm93_vm3, %v105_v25, 1.0  ;;  %249 = vlog2.f32 %v116_v29  ;;  %p269_p4 = pnand %p268_p3, %p262_p0 }
  0x13   :  { %v244_v33 = vpop.eup %243  ;;  %v111_v34 = vmul.f32 %v242_v30, %v88_v20  ;;  %v118_v35 = vsel %vm94_vm4, %v107_v28, 1.0  ;;  %251 = vlog2.f32 %v117_v32 }
  0x14   :  { %v113_v36 = vmul.f32 %v244_v33, %v89_v24  ;;  %v119_v37 = vsel %vm95_vm5, %v109_v31, 1.0  ;;  %253 = vlog2.f32 %v118_v35 }
  0x15   :  { %v120_v38 = vsel %vm96_vm6, %v111_v34, 1.0  ;;  %255 = vlog2.f32 %v119_v37 }
  0x16   :  { %v121_v39 = vsel %vm97_vm7, %v113_v36, 1.0  ;;  %257 = vlog2.f32 %v120_v38 }
  0x17   :  { %259 = vlog2.f32 %v121_v39 }
  0x1a   :  { %v246_v40 = vpop.eup %245 }
  0x1b   :  { %v248_v41 = vpop.eup %247  ;;  %v131_v42 = vmul.f32 0.6931472, %v246_v40 }
  0x1c   :  { %v250_v43 = vpop.eup %249  ;;  %v133_v44 = vmul.f32 0.6931472, %v248_v41 }
  0x1d   :  { %v252_v45 = vpop.eup %251  ;;  %v135_v46 = vmul.f32 0.6931472, %v250_v43  ;;  %v146_v47 = vmul.f32 %v131_v42, %v82_v8 }
  0x1e   :  { %v254_v48 = vpop.eup %253  ;;  %v137_v49 = vmul.f32 0.6931472, %v252_v45  ;;  %v147_v50 = vmul.f32 %v133_v44, %v83_v9 }
  0x1f   :  { %v256_v51 = vpop.eup %255  ;;  %v139_v52 = vmul.f32 0.6931472, %v254_v48  ;;  %v148_v53 = vmul.f32 %v135_v46, %v84_v10 }
  0x20   :  { %v258_v54 = vpop.eup %257  ;;  %v141_v55 = vmul.f32 0.6931472, %v256_v51  ;;  %v149_v56 = vmul.f32 %v137_v49, %v85_v12  ;;  %v181_v57 = vadd.f32 %v147_v50, %v146_v47 }
  0x21   :  { %v260_v58 = vpop.eup %259  ;;  %v143_v59 = vmul.f32 0.6931472, %v258_v54  ;;  %v150_v60 = vmul.f32 %v139_v52, %v86_v14 }
  0x22   :  { %v182_v61 = vadd.f32 %v181_v57, %v148_v53  ;;  %v145_v62 = vmul.f32 0.6931472, %v260_v58  ;;  %v151_v63 = vmul.f32 %v141_v55, %v87_v17 }
  0x23   :  { %v152_v1 = vmul.f32 %v143_v59, %v88_v20 }
  0x24   :  { %v183_v0 = vadd.f32 %v182_v61, %v149_v56  ;;  %v153_v3 = vmul.f32 %v145_v62, %v89_v24 }
  0x26   :  { %v184_v2 = vadd.f32 %v183_v0, %v150_v60 }
  0x28   :  { %v185_v4 = vadd.f32 %v184_v2, %v151_v63 }
  0x2a   :  { %v186_v5 = vadd.f32 %v185_v4, %v152_v1 }
  0x2c   :  { %v187_v6 = vadd.f32 %v186_v5, %v153_v3 }
  0x2e   :  { %188 = vadd.xlane.f32.xlu0 %v187_v6 }
  0xbb   :  { %v189_v7 = vpop.xlane.xlu0 %188 }
  0xbc   :  { %v190_v8 = vrot.slane %v189_v7, 4 }
  0xbe   :  { %v191_v9 = vadd.f32 %v190_v8, %v189_v7 }
  0xc0   :  { %v192_v10 = vrot.slane %v191_v9, 2 }
  0xc2   :  { %v193_v11 = vadd.f32 %v192_v10, %v191_v9 }
  0xc4   :  { %v194_v12 = vrot.slane %v193_v11, 1 }
  0xc6   :  { %v195_v13 = vadd.f32 %v194_v12, %v193_v11 }
  0xc8   :  { %226 = vpush %v195_v13 }
  0xf9   :  { %s227_s13 = spop %226 }
  0xfa   :  { %v197_v14 = vstv %s227_s13 }
  0xfb   :  { %199 = vst.msk [vmem:[#allocation3] sm:$0x1] %vm198_vm8, %v197_v14 }
  0xfc   :  { %272 = shalt.err (!%p269_p4)
}
  0xfd   :  { %s273_s18 = scalar_lea.hbm %s366_s2, 16 }
  0xfe   :  { %p274_p5 = scmp.ne.s32.totalorder %s366_s2, %s273_s18  ;;  %p277_p6 = scmp.lt.u32.totalorder %s273_s18, %s366_s2 }
 0x100   :  { %p279_p7 = pnand %p277_p6, %p274_p5 }
 0x102   :  { %282 = shalt.err (!%p279_p7)
}
 0x103   :  { %209 = dma.vmem_to_hbm [thread:$0]  %s207_s12, 16, %s366_s2, [#allocation4]  }
 0x104   :  { %283 = dma.done.wait [#allocation4], 16  }
 0x105   :  { %284 = vsyncadd [#allocation4], 4294967280 }
 0x106   :  { %213 = vsyncpa [#allocation4], 1 }

</bundles_post_ra>
